<compile_context>
chip_gen: v7x
topology: tpu7x:2x2x1
jax: 0.10.0
libtpu: 0.0.40
codegen_flags: <defaults>
</compile_context>

<pallas_src>
import numpy as np
import jax
import jax.numpy as jnp
from jax import lax
from jax.experimental import pallas as pl
from jax.experimental.pallas import tpu as pltpu


def _round_up(n, m):
    return ((n + m - 1) // m) * m


# ----------------------------------------------------------------------------
# Parameter / fused-weight construction (mirrors EmbeddingGenerator.__init__)
# ----------------------------------------------------------------------------
def make_embedding_generator(input_dim, cat_dims, cat_idxs, cat_emb_dims,
                             group_matrix, key):
    if cat_dims == [] and cat_idxs == []:
        # skip_embedding path: forward is identity.
        return dict(skip_embedding=True, post_embed_dim=input_dim,
                    embedding_group_matrix=np.array(group_matrix, np.float32))

    if isinstance(cat_emb_dims, int):
        cat_emb_dims = [cat_emb_dims] * len(cat_dims)

    continuous_idx = np.ones(input_dim, dtype=bool)
    continuous_idx[np.asarray(cat_idxs, dtype=int)] = False
    post_embed_dim = int(input_dim + sum(cat_emb_dims) - len(cat_emb_dims))

    # nn.Embedding default init: N(0, 1), one table per categorical feature.
    keys = jax.random.split(key, len(cat_dims))
    tables = [np.array(jax.random.normal(keys[i],
                                         (cat_dims[i], cat_emb_dims[i]),
                                         dtype=jnp.float32))
              for i in range(len(cat_dims))]

    total_vocab = int(sum(cat_dims))
    vocab_off = np.cumsum([0] + list(cat_dims))[:-1].astype(np.int32)

    # Fused weight matrix W, laid out to match the in-kernel operand
    #   z = [ x (input_dim cols) | zero pad to x_pad | onehot (total_vocab) ]
    # Output columns are zero-padded to a lane-dense multiple of 128.
    x_pad = _round_up(input_dim, 128)
    post_pad = _round_up(post_embed_dim, 128)
    W = np.zeros((x_pad + total_vocab, post_pad), np.float32)

    cat_feat_order = []          # feature index of the k-th categorical feature
    post = 0
    c = 0
    for f in range(input_dim):
        if continuous_idx[f]:
            W[f, post] = 1.0
            post += 1
        else:
            d = cat_emb_dims[c]
            v0 = int(vocab_off[c])
            W[x_pad + v0: x_pad + v0 + cat_dims[c], post:post + d] = tables[c]
            cat_feat_order.append(f)
            post += d
            c += 1
    assert post == post_embed_dim

    # embedding_group_matrix (built in __init__, not used by forward).
    gm = np.array(group_matrix, np.float32)
    egm = np.zeros((gm.shape[0], post_embed_dim), np.float32)
    for g in range(gm.shape[0]):
        p = 0
        c = 0
        for f in range(input_dim):
            if continuous_idx[f]:
                egm[g, p] = gm[g, f]
                p += 1
            else:
                n = cat_emb_dims[c]
                egm[g, p:p + n] = gm[g, f] / n
                p += n
                c += 1

    return dict(skip_embedding=False,
                post_embed_dim=post_embed_dim,
                post_pad=post_pad,
                x_pad=x_pad,
                input_dim=input_dim,
                total_vocab=total_vocab,
                continuous_idx=continuous_idx,
                tables=tables,
                W=jnp.asarray(W),
                cat_feat_order=np.asarray(cat_feat_order, np.int32),
                vocab_off=vocab_off,
                embedding_group_matrix=egm)


# ----------------------------------------------------------------------------
# Pallas kernel: in-kernel codes + one-hot build, single fused MXU matmul
# ----------------------------------------------------------------------------
def _make_kernel(input_dim, x_pad, total_vocab, cat_feat_idxs, vocab_off):
    cat_feat_idxs = tuple(int(v) for v in cat_feat_idxs)
    vocab_off = tuple(int(v) for v in vocab_off)

    def kernel(x_ref, w_ref, o_ref, z_ref):
        # Zero the persistent scratch once: the [input_dim, x_pad) padding
        # columns must be 0 and are never written afterwards.
        @pl.when(pl.program_id(0) == 0)
        def _():
            z_ref[...] = jnp.zeros_like(z_ref)

        x = x_ref[...]                                   # (tb, input_dim) f32
        tb = x.shape[0]

        # One-hot over the stacked vocabulary.  Per-feature vocab ranges are
        # disjoint, so OR of the compares == concat of per-feature one-hots.
        # (Out-of-range / negative codes silently yield an all-zero row,
        #  unlike torch nn.Embedding which would raise.)
        iota = lax.broadcasted_iota(jnp.int32, (tb, total_vocab), 1)
        hit = None
        for f, off in zip(cat_feat_idxs, vocab_off):
            code = x[:, f:f + 1].astype(jnp.int32) + off     # trunc, like .long()
            h = iota == code
            hit = h if hit is None else (hit | h)
        onehot = hit.astype(jnp.float32)                 # (tb, total_vocab)

        # z = [ x | 0-pad | onehot ]; both stores are at lane-aligned offsets.
        z_ref[:, :input_dim] = x
        z_ref[:, x_pad:] = onehot

        # Single fused matmul on the MXU, lane-dense (128-multiple) output.
        o_ref[...] = jnp.dot(z_ref[...], w_ref[...],
                             preferred_element_type=jnp.float32)

    return kernel


def embedding_generator_forward(params, x, *, tb=256):
    """x: (batch, input_dim) float32 -> (batch, post_embed_dim) float32."""
    if params["skip_embedding"]:
        return x

    B, input_dim = x.shape
    W = params["W"]
    Kz, post_pad = W.shape
    x_pad = params["x_pad"]
    total_vocab = params["total_vocab"]
    post_dim = params["post_embed_dim"]

    # Batch tiling: clip the tile to the (8-rounded) batch, pad the batch to a
    # tile multiple, slice the padding off afterwards.
    tb_eff = int(min(_round_up(tb, 8), _round_up(B, 8)))
    Bp = _round_up(B, tb_eff)
    xp = x.astype(jnp.float32)
    if Bp != B:
        xp = jnp.pad(xp, ((0, Bp - B), (0, 0)))

    kernel = _make_kernel(input_dim, x_pad, total_vocab,
                          params["cat_feat_order"], params["vocab_off"])

    out = pl.pallas_call(
        kernel,
        out_shape=jax.ShapeDtypeStruct((Bp, post_pad), jnp.float32),
        grid_spec=pltpu.PrefetchScalarGridSpec(
            num_scalar_prefetch=0,
            grid=(Bp // tb_eff,),
            in_specs=[
                pl.BlockSpec((tb_eff, input_dim), lambda i: (i, 0)),
                # Grid-invariant fused weights: single-buffer (halves VMEM).
                pl.BlockSpec((Kz, post_pad), lambda i: (0, 0),
                             pipeline_mode=pl.Buffered(1)),
            ],
            out_specs=pl.BlockSpec((tb_eff, post_pad), lambda i: (i, 0)),
            scratch_shapes=[pltpu.VMEM((tb_eff, Kz), jnp.float32)],
        ),
        compiler_params=pltpu.CompilerParams(
            dimension_semantics=("parallel",),
            vmem_limit_bytes=64 * 1024 * 1024),
    )(xp, W)

    return out[:B, :post_dim]


# ----------------------------------------------------------------------------
# Reference (pure JAX, mirrors the torch forward loop) + demo
# ----------------------------------------------------------------------------
def reference_forward(params, x):
    if params["skip_embedding"]:
        return x
    cols = []
    c = 0
    for f in range(x.shape[1]):
        if params["continuous_idx"][f]:
            cols.append(x[:, f:f + 1].astype(jnp.float32))
        else:
            idx = x[:, f].astype(jnp.int32)
            cols.append(jnp.take(jnp.asarray(params["tables"][c]), idx, axis=0))
            c += 1
    return jnp.concatenate(cols, axis=1)


if __name__ == "__main__":
    key = jax.random.PRNGKey(0)
    k_emb, k_cont, k_cat, k_grp = jax.random.split(key, 4)

    # small TabNet-style config; batch deliberately NOT a multiple of the tile
    batch = 19
    input_dim = 16
    cat_idxs = [1, 4, 7, 10]
    cat_dims = [5, 8, 3, 12]
    cat_emb_dims = [3, 4, 2, 5]          # post_embed_dim = 16 + 14 - 4 = 26
    n_groups = 3

    group_matrix = jax.random.uniform(k_grp, (n_groups, input_dim),
                                      dtype=jnp.float32)

    params = make_embedding_generator(input_dim, cat_dims, cat_idxs,
                                      cat_emb_dims, group_matrix, k_emb)

    # input: continuous columns ~N(0,1); categorical columns hold integer codes
    x_np = np.array(jax.random.normal(k_cont, (batch, input_dim),
                                      dtype=jnp.float32))   # writable copy
    code_keys = jax.random.split(k_cat, len(cat_idxs))
    for k, (ci, cd) in enumerate(zip(cat_idxs, cat_dims)):
        codes = jax.random.randint(code_keys[k], (batch,), 0, cd)
        x_np[:, ci] = np.array(codes, dtype=np.float32)
    x = jnp.asarray(x_np)

    out = embedding_generator_forward(params, x)
    out = jax.block_until_ready(out)

    ref = reference_forward(params, x)
    assert out.shape == (batch, params["post_embed_dim"])
    assert np.allclose(np.asarray(out), np.asarray(ref), atol=1e-4, rtol=1e-4)

    print("KERNEL_OK")
</pallas_src>

<mosaic_0001>
module attributes {stable_mosaic.version = 11 : i64} {
  func.func @kernel(%arg0: i32, %arg1: memref<24x16xf32, #tpu.memory_space<vmem>>, %arg2: memref<156x128xf32, #tpu.memory_space<vmem>>, %arg3: memref<24x128xf32, #tpu.memory_space<vmem>>, %arg4: memref<24x156xf32, #tpu.memory_space<vmem>>) attributes {dimension_semantics = [#tpu.dimension_semantics<parallel>], iteration_bounds = array<i64: 1>, scalar_prefetch = 0 : i64, scratch_operands = 1 : i64, tpu.core_type = #tpu.core_type<tc>, window_params = [{transform_indices = @transform_0, window_bounds = array<i64: 24, 16>}, {pipeline_mode = #tpu.pipeline_mode<synchronous>, transform_indices = @transform_1, window_bounds = array<i64: 156, 128>}, {transform_indices = @transform_2, window_bounds = array<i64: 24, 128>}]} {
    %c0_i32 = arith.constant 0 : i32
    %0 = arith.cmpi eq, %arg0, %c0_i32 : i32
    %1 = arith.extui %0 : i1 to i32
    %c0_i32_0 = arith.constant 0 : i32
    %2 = arith.cmpi ne, %1, %c0_i32_0 : i32
    scf.if %2 {
      %cst_12 = arith.constant 0.000000e+00 : f32
      %40 = vector.broadcast %cst_12 : f32 to vector<24x156xf32>
      %c0_13 = arith.constant 0 : index
      %c0_14 = arith.constant 0 : index
      %41 = vector.load %arg4[%c0_13, %c0_14] : memref<24x156xf32, #tpu.memory_space<vmem>>, vector<24x156xf32>
      tpu.vector_store %arg4[%c0_13, %c0_14], %40 {strides = array<i32>} : memref<24x156xf32, #tpu.memory_space<vmem>>, vector<24x156xf32>,
    } else {
    }
    %c0 = arith.constant 0 : index
    %c0_1 = arith.constant 0 : index
    %3 = vector.load %arg1[%c0, %c0_1] : memref<24x16xf32, #tpu.memory_space<vmem>>, vector<24x16xf32>
    %4 = tpu.iota {dimensions = array<i32: 1>} : vector<24x28xi32>
    %5 = vector.extract_strided_slice %3 {offsets = [0, 1], sizes = [24, 1], strides = [1, 1]} : vector<24x16xf32> to vector<24x1xf32>
    %6 = arith.fptosi %5 : vector<24x1xf32> to vector<24x1xi32>
    %c0_i32_2 = arith.constant 0 : i32
    %7 = vector.broadcast %c0_i32_2 : i32 to vector<24x1xi32>
    %8 = arith.addi %6, %7 : vector<24x1xi32>
    %9 = vector.broadcast %8 : vector<24x1xi32> to vector<24x28xi32>
    %10 = arith.cmpi eq, %4, %9 : vector<24x28xi32>
    %11 = vector.extract_strided_slice %3 {offsets = [0, 4], sizes = [24, 1], strides = [1, 1]} : vector<24x16xf32> to vector<24x1xf32>
    %12 = arith.fptosi %11 : vector<24x1xf32> to vector<24x1xi32>
    %c5_i32 = arith.constant 5 : i32
    %13 = vector.broadcast %c5_i32 : i32 to vector<24x1xi32>
    %14 = arith.addi %12, %13 : vector<24x1xi32>
    %15 = vector.broadcast %14 : vector<24x1xi32> to vector<24x28xi32>
    %16 = arith.cmpi eq, %4, %15 : vector<24x28xi32>
    %17 = arith.ori %10, %16 : vector<24x28xi1>
    %18 = vector.extract_strided_slice %3 {offsets = [0, 7], sizes = [24, 1], strides = [1, 1]} : vector<24x16xf32> to vector<24x1xf32>
    %19 = arith.fptosi %18 : vector<24x1xf32> to vector<24x1xi32>
    %c13_i32 = arith.constant 13 : i32
    %20 = vector.broadcast %c13_i32 : i32 to vector<24x1xi32>
    %21 = arith.addi %19, %20 : vector<24x1xi32>
    %22 = vector.broadcast %21 : vector<24x1xi32> to vector<24x28xi32>
    %23 = arith.cmpi eq, %4, %22 : vector<24x28xi32>
    %24 = arith.ori %17, %23 : vector<24x28xi1>
    %25 = vector.extract_strided_slice %3 {offsets = [0, 10], sizes = [24, 1], strides = [1, 1]} : vector<24x16xf32> to vector<24x1xf32>
    %26 = arith.fptosi %25 : vector<24x1xf32> to vector<24x1xi32>
    %c16_i32 = arith.constant 16 : i32
    %27 = vector.broadcast %c16_i32 : i32 to vector<24x1xi32>
    %28 = arith.addi %26, %27 : vector<24x1xi32>
    %29 = vector.broadcast %28 : vector<24x1xi32> to vector<24x28xi32>
    %30 = arith.cmpi eq, %4, %29 : vector<24x28xi32>
    %31 = arith.ori %24, %30 : vector<24x28xi1>
    %32 = arith.extui %31 : vector<24x28xi1> to vector<24x28xi32>
    %33 = arith.sitofp %32 : vector<24x28xi32> to vector<24x28xf32>
    %c0_3 = arith.constant 0 : index
    %c0_4 = arith.constant 0 : index
    %34 = vector.load %arg4[%c0_3, %c0_4] : memref<24x156xf32, #tpu.memory_space<vmem>>, vector<24x16xf32>
    tpu.vector_store %arg4[%c0_3, %c0_4], %3 {strides = array<i32>} : memref<24x156xf32, #tpu.memory_space<vmem>>, vector<24x16xf32>,
    %c0_5 = arith.constant 0 : index
    %c128 = arith.constant 128 : index
    %35 = vector.load %arg4[%c0_5, %c128] : memref<24x156xf32, #tpu.memory_space<vmem>>, vector<24x28xf32>
    tpu.vector_store %arg4[%c0_5, %c128], %33 {strides = array<i32>} : memref<24x156xf32, #tpu.memory_space<vmem>>, vector<24x28xf32>,
    %c0_6 = arith.constant 0 : index
    %c0_7 = arith.constant 0 : index
    %36 = vector.load %arg4[%c0_6, %c0_7] : memref<24x156xf32, #tpu.memory_space<vmem>>, vector<24x156xf32>
    %c0_8 = arith.constant 0 : index
    %c0_9 = arith.constant 0 : index
    %37 = vector.load %arg2[%c0_8, %c0_9] : memref<156x128xf32, #tpu.memory_space<vmem>>, vector<156x128xf32>
    %cst = arith.constant dense<0.000000e+00> : vector<24x128xf32>
    %38 = tpu.matmul %36, %37, %cst {dimension_numbers = #tpu.dot_dimension_numbers<[1], [0], [0], [1], [0, 0, 1, 1], [], []>} : vector<24x156xf32>, vector<156x128xf32>, vector<24x128xf32> -> vector<24x128xf32>
    %c0_10 = arith.constant 0 : index
    %c0_11 = arith.constant 0 : index
    %39 = vector.load %arg3[%c0_10, %c0_11] : memref<24x128xf32, #tpu.memory_space<vmem>>, vector<24x128xf32>
    tpu.vector_store %arg3[%c0_10, %c0_11], %38 {strides = array<i32>} : memref<24x128xf32, #tpu.memory_space<vmem>>, vector<24x128xf32>,
    return
  }
  func.func @transform_0(%arg0: i32) -> (i32, i32) {
    %c0_i32 = arith.constant 0 : i32
    %c0_i32_0 = arith.constant 0 : i32
    return %arg0, %c0_i32 : i32, i32
  }
  func.func @transform_1(%arg0: i32) -> (i32, i32) {
    %c0_i32 = arith.constant 0 : i32
    %c0_i32_0 = arith.constant 0 : i32
    %c0_i32_1 = arith.constant 0 : i32
    return %c0_i32, %c0_i32_0 : i32, i32
  }
  func.func @transform_2(%arg0: i32) -> (i32, i32) {
    %c0_i32 = arith.constant 0 : i32
    %c0_i32_0 = arith.constant 0 : i32
    return %arg0, %c0_i32 : i32, i32
  }
}

</mosaic_0001>

<bundles_post_ra>
// kernel: tpu_custom_call.1
= control target key start
LH: loop header
LB: loop body
LE: loop exit
PB: predicated region body
PF: predicated region fallthrough
CT: control target
= control target key end

     0   :  { %7 = vsyncpa [#allocation4], 0  ;;  %s557_s0 = inlined_call_operand.hbm [shape: f32[24,16], index: 0, kind: input, shape index: {}]   ;;  %s558_s1 = inlined_call_operand.hbm [shape: f32[156,128], index: 1, kind: input, shape index: {}]   ;;  %s559_s2 = inlined_call_operand.hbm [shape: f32[24,128], index: 2, kind: output, shape index: {}]  }
   0x1   :  { %8 = vsyncpa [#allocation7], 0 }
   0x2   :  { %9 = vsyncpa [#allocation5], 0  ;;  %s438_s9 = smov [#allocation3]   ;;  %s366_s13 = scalar_lea.hbm %s557_s0, 384 }
   0x3   :  { %s15_s10 = sshll.u32 %s438_s9, 4  ;;  %p367_p0 = scmp.ne.s32.totalorder %s557_s0, %s366_s13  ;;  %s16_s10 = int_to_ptr.vmem [resolvable:$true] %s15_s10 }
   0x4   :  { %p370_p1 = scmp.lt.u32.totalorder %s366_s13, %s557_s0 }
   0x6   :  { %p372_p2 = pnand %p370_p1, %p367_p0 }
   0x8   :  { %375 = shalt.err (!%p372_p2)
}
   0x9   :  { %s376_s18 = scalar_lea.vmem %s16_s10, 384  ;;  %p381_p4 = scmp.lt.s32.totalorder %s16_s10, %s16_s10 }
   0xa   :  { %p377_p3 = scmp.ne.s32.totalorder %s16_s10, %s376_s18  ;;  %p382_p5 = scmp.lt.s32.totalorder %s376_s18, %s376_s18 }
   0xc   :  { %p383_p6 = por %p382_p5, %p381_p4 }
   0xe   :  { %p384_p7 = pnand %p383_p6, %p377_p3 }
  0x10   :  { %387 = shalt.err (!%p384_p7)
}
  0x11   :  { %s439_s19 = smov 128   ;;  %s440_s20 = smov 8  }
  0x12   :  { %21 = dma.hbm_to_vmem [thread:$0]  %s557_s0, 384, %s16_s10, [#allocation4], %s439_s19, %s439_s19, %s440_s20  }
  0x13   :  { %s441_s23 = smov [#allocation6]   ;;  %s388_s27 = scalar_lea.hbm %s558_s1, 2560 }
  0x14   :  { %s27_s24 = sshll.u32 %s441_s23, 4  ;;  %p389_p8 = scmp.ne.s32.totalorder %s558_s1, %s388_s27  ;;  %s28_s24 = int_to_ptr.vmem [resolvable:$true] %s27_s24 }
  0x15   :  { %p392_p9 = scmp.lt.u32.totalorder %s388_s27, %s558_s1 }
  0x17   :  { %p394_p10 = pnand %p392_p9, %p389_p8 }
  0x19   :  { %397 = shalt.err (!%p394_p10)
}
  0x1a   :  { %s398_s4 = scalar_lea.vmem %s28_s24, 2560  ;;  %p403_p12 = scmp.lt.s32.totalorder %s28_s24, %s28_s24 }
  0x1b   :  { %p399_p11 = scmp.ne.s32.totalorder %s28_s24, %s398_s4  ;;  %p404_p13 = scmp.lt.s32.totalorder %s398_s4, %s398_s4 }
  0x1d   :  { %p405_p0 = por %p404_p13, %p403_p12 }
  0x1f   :  { %p406_p1 = pnand %p405_p0, %p399_p11 }
  0x21   :  { %409 = shalt.err (!%p406_p1)
}
  0x22   :  { %33 = dma.hbm_to_vmem [thread:$0]  %s558_s1, 2560, %s28_s24, [#allocation7], %s439_s19, %s439_s19, %s440_s20  }
  0x23   :  { %432 = dma.done.wait [#allocation4], 384  }
  0x24   :  { %433 = vsyncadd [#allocation4], 4294966912 }
  0x25   :  { %434 = dma.done.wait [#allocation7], 2560  }
  0x26   :  { %435 = vsyncadd [#allocation7], 4294964736  ;;  %v442_v0 = vmov 1   ;;  %v443_v1 = vmov 0.0   ;;  %v444_v2 = vmov 0.0|0.0   ;;  %vm131_vm0 = vcmask 130048  }
  0x27   :  { %356 = vset.pattern.permute.xlu1 %v442_v0  ;;  %355 = vset.pattern.permute.xlu0 %v442_v0  ;;  %47 = vst [vmem:[#allocation2 + $0x10] sm:$0xff] %v443_v1  ;;  %44 = vst [vmem:[#allocation2] sm:$0xff] %v443_v1  ;;  %v52_v3 = vld [vmem:[#allocation3 + $0x8] sm:$0xff]  ;;  %v51_v4 = vld [vmem:[#allocation3] sm:$0xff]  ;;  %v445_v22 = vmov 4   ;;  %v446_v23 = vmov 7   ;;  %v54_v54 = vlaneseq }
  0x28   :  { %49 = vst [vmem:[#allocation2 + $0x20] sm:$0xff] %v443_v1  ;;  %317 = vmatprep.subr.bf16.mxu1 %v444_v2  ;;  %286 = vmatprep.subr.bf16.mxu0 %v444_v2  ;;  %v53_v5 = vld [vmem:[#allocation3 + $0x10] sm:$0xff]  ;;  %v339_v6 = vtrunc.f32 %v52_v3  ;;  %133 = vst.msk [vmem:[#allocation2 + $0x10] sm:$0xff] %vm131_vm0, %v52_v3  ;;  %v337_v7 = vtrunc.f32 %v51_v4  ;;  %v145_v8 = vld [vmem:[#allocation6] sm:$0xff]  ;;  %vm45_vm1 = vcmask 228352   ;;  %v447_v29 = vmov 10  }
  0x29   :  { %132 = vst.msk [vmem:[#allocation2] sm:$0xff] %vm131_vm0, %v51_v4  ;;  %134 = vst.msk [vmem:[#allocation2 + $0x20] sm:$0xff] %vm131_vm0, %v53_v5  ;;  %v146_v9 = vld [vmem:[#allocation6 + $0x8] sm:$0xff]  ;;  %v147_v11 = vld [vmem:[#allocation6 + $0x10] sm:$0xff]  ;;  %v341_v20 = vtrunc.f32 %v53_v5  ;;  %vm174_vm2 = vcmask 1043456   ;;  %vm448_vm3 = vmmov 1  }
  0x2a   :  { %v287_v10 = vpack.c.bf16 %v146_v9, %v145_v8  ;;  %v148_v12 = vld [vmem:[#allocation6 + $0x18] sm:$0xff]  ;;  %v340_v13 = vcvt.f32.s32 %v339_v6  ;;  %v502_v14 = vcvt.f32.s32 %v337_v7  ;;  %v149_v16 = vld [vmem:[#allocation6 + $0x20] sm:$0xff]  ;;  %v150_v17 = vld [vmem:[#allocation6 + $0x28] sm:$0xff]  ;;  %48 = vst.msk [vmem:[#allocation2 + $0x18] sm:$0xff] %vm45_vm1, %v443_v1  ;;  %v55_v57 = vand.u32 127, %v54_v54  ;;  %s449_s1 = smov [#allocation8]  }
  0x2b   :  { %v290_v15 = vpack.c.bf16 %v148_v12, %v147_v11  ;;  %v293_v21 = vpack.c.bf16 %v150_v17, %v149_v16  ;;  %v151_v24 = vld [vmem:[#allocation6 + $0x30] sm:$0xff]  ;;  %v152_v25 = vld [vmem:[#allocation6 + $0x38] sm:$0xff]  ;;  %v342_v27 = vcvt.f32.s32 %v341_v20  ;;  %46 = vst.msk [vmem:[#allocation2 + $0x8] sm:$0xff] %vm45_vm1, %v443_v1  ;;  %50 = vst.msk [vmem:[#allocation2 + $0x28] sm:$0xff] %vm45_vm1, %v443_v1  ;;  %s266_s6 = sshll.u32 %s449_s1, 4  ;;  %s267_s6 = int_to_ptr.vmem [resolvable:$true] %s266_s6 }
  0x2c   :  { %327 = vmatpush1.bf16.msra.mxu1 %v287_v10  ;;  %288 = vmatpush1.bf16.msra.mxu0 %v287_v10  ;;  %v72_v18 = vadd.s32 5, %v340_v13  ;;  %v90_v19 = vadd.s32 13, %v340_v13  ;;  %v108_v26 = vadd.s32 16, %v340_v13  ;;  %v296_v28 = vpack.c.bf16 %v152_v25, %v151_v24  ;;  %v153_v30 = vld [vmem:[#allocation6 + $0x40] sm:$0xff]  ;;  %v154_v31 = vld [vmem:[#allocation6 + $0x48] sm:$0xff]  ;;  %v155_v35 = vld [vmem:[#allocation6 + $0x50] sm:$0xff]  ;;  %p415_p3 = scmp.lt.s32.totalorder %s267_s6, %s267_s6 }
  0x2d   :  { %63 = vperm.xlu0 %355, %v340_v13   ;;  %60 = vperm.xlu1 %356, %v502_v14   ;;  %v71_v32 = vadd.s32 5, %v502_v14  ;;  %v89_v33 = vadd.s32 13, %v502_v14  ;;  %v299_v34 = vpack.c.bf16 %v154_v31, %v153_v30  ;;  %v156_v36 = vld [vmem:[#allocation6 + $0x58] sm:$0xff]  ;;  %v73_v37 = vadd.s32 5, %v342_v27  ;;  %v157_v40 = vld [vmem:[#allocation6 + $0x60] sm:$0xff]  ;;  %v158_v41 = vld [vmem:[#allocation6 + $0x68] sm:$0xff] }
  0x2e   :  { %318 = vmatprep.subr.bf16.mxu1 %v444_v2  ;;  %289 = vmatprep.subr.bf16.mxu0 %v444_v2  ;;  %v109_v38 = vadd.s32 16, %v342_v27  ;;  %v302_v39 = vpack.c.bf16 %v156_v36, %v155_v35  ;;  %v91_v42 = vadd.s32 13, %v342_v27  ;;  %v305_v43 = vpack.c.bf16 %v158_v41, %v157_v40  ;;  %v159_v44 = vld [vmem:[#allocation6 + $0x70] sm:$0xff]  ;;  %v160_v45 = vld [vmem:[#allocation6 + $0x78] sm:$0xff]  ;;  %v161_v48 = vld [vmem:[#allocation6 + $0x80] sm:$0xff]  ;;  %s410_s7 = scalar_lea.vmem %s267_s6, 384 }
  0x2f   :  { %v308_v46 = vpack.c.bf16 %v160_v45, %v159_v44  ;;  %v107_v47 = vadd.s32 16, %v502_v14  ;;  %v162_v49 = vld [vmem:[#allocation6 + $0x88] sm:$0xff]  ;;  %v163_v51 = vld [vmem:[#allocation6 + $0x90] sm:$0xff]  ;;  %v164_v52 = vld [vmem:[#allocation6 + $0x98] sm:$0xf]  ;;  %p411_p2 = scmp.ne.s32.totalorder %s267_s6, %s410_s7  ;;  %p416_p4 = scmp.lt.s32.totalorder %s410_s7, %s410_s7 }
  0x30   :  { %328 = vmatpush1.bf16.msra.mxu1 %v290_v15  ;;  %291 = vmatpush1.bf16.msra.mxu0 %v290_v15  ;;  %v311_v50 = vpack.c.bf16 %v162_v49, %v161_v48  ;;  %v314_v53 = vpack.c.bf16 %v164_v52, %v163_v51  ;;  %vm315_vm4 = vmpackc.low %vm174_vm2, %vm448_vm3  ;;  %v141_v3 = vld [vmem:[#allocation2 + $0x10] sm:$0xff]  ;;  %v143_v10 = vld [vmem:[#allocation2 + $0x20] sm:$0xff] }
  0x31   :  { %357 = vset.pattern.permute.xlu0 %v445_v22  ;;  %359 = vset.pattern.permute.xlu1 %v446_v23  ;;  %v139_v12 = vld [vmem:[#allocation2] sm:$0xff]  ;;  %p417_p5 = por %p416_p4, %p415_p3 }
  0x32   :  { %78 = vperm.xlu0 %357, %v72_v18   ;;  %96 = vperm.xlu1 %359, %v90_v19  }
  0x33   :  { %319 = vmatprep.subr.bf16.mxu1 %v444_v2  ;;  %292 = vmatprep.subr.bf16.mxu0 %v444_v2  ;;  %p418_p6 = pnand %p417_p5, %p411_p2 }
  0x34   :  { %329 = vmatpush1.bf16.msra.mxu1 %v293_v21  ;;  %294 = vmatpush1.bf16.msra.mxu0 %v293_v21 }
  0x35   :  { %320 = vmatprep.subr.bf16.mxu1 %v444_v2  ;;  %295 = vmatprep.subr.bf16.mxu0 %v444_v2 }
  0x36   :  { %360 = vset.pattern.permute.xlu1 %v447_v29  ;;  %358 = vset.pattern.permute.xlu0 %v442_v0 }
  0x37   :  { %114 = vperm.xlu1 %360, %v108_v26   ;;  %66 = vperm.xlu0 %358, %v342_v27  }
  0x38   :  { %330 = vmatpush1.bf16.msra.mxu1 %v296_v28  ;;  %297 = vmatpush1.bf16.msra.mxu0 %v296_v28 }
  0x39   :  { %321 = vmatprep.subr.bf16.mxu1 %v444_v2  ;;  %298 = vmatprep.subr.bf16.mxu0 %v444_v2 }
  0x3b   :  { %361 = vset.pattern.permute.xlu1 %v445_v22  ;;  %362 = vset.pattern.permute.xlu0 %v446_v23 }
  0x3c   :  { %75 = vperm.xlu1 %361, %v71_v32   ;;  %93 = vperm.xlu0 %362, %v89_v33  }
  0x3d   :  { %331 = vmatpush1.bf16.msra.mxu1 %v299_v34  ;;  %300 = vmatpush1.bf16.msra.mxu0 %v299_v34 }
  0x3e   :  { %322 = vmatprep.subr.bf16.mxu1 %v444_v2  ;;  %301 = vmatprep.subr.bf16.mxu0 %v444_v2 }
  0x40   :  { %81 = vperm.xlu1 %361, %v73_v37   ;;  %365 = vset.pattern.permute.xlu0 %v447_v29 }
  0x41   :  { %117 = vperm.xlu0 %365, %v109_v38   ;;  %332 = vmatpush1.bf16.msra.mxu1 %v302_v39 }
  0x42   :  { %323 = vmatprep.subr.bf16.mxu1 %v444_v2  ;;  %303 = vmatpush1.bf16.msra.mxu0 %v302_v39 }
  0x43   :  { %304 = vmatprep.subr.bf16.mxu0 %v444_v2 }
  0x44   :  { %363 = vset.pattern.permute.xlu1 %v446_v23 }
  0x45   :  { %99 = vperm.xlu1 %363, %v91_v42   ;;  %333 = vmatpush1.bf16.msra.mxu1 %v305_v43 }
  0x46   :  { %324 = vmatprep.subr.bf16.mxu1 %v444_v2  ;;  %306 = vmatpush1.bf16.msra.mxu0 %v305_v43 }
  0x47   :  { %307 = vmatprep.subr.bf16.mxu0 %v444_v2 }
  0x49   :  { %364 = vset.pattern.permute.xlu1 %v447_v29  ;;  %334 = vmatpush1.bf16.msra.mxu1 %v308_v46 }
  0x4a   :  { %111 = vperm.xlu1 %364, %v107_v47   ;;  %325 = vmatprep.subr.bf16.mxu1 %v444_v2 }
  0x4b   :  { %309 = vmatpush1.bf16.msra.mxu0 %v308_v46 }
  0x4c   :  { %310 = vmatprep.subr.bf16.mxu0 %v444_v2 }
  0x4d   :  { %335 = vmatpush1.bf16.msra.mxu1 %v311_v50 }
  0x4e   :  { %326 = vmatprep.subr.bf16.mxu1 %v444_v2 }
  0x4f   :  { %312 = vmatpush1.bf16.msra.mxu0 %v311_v50 }
  0x50   :  { %313 = vmatprep.subr.bf16.mxu0 %v444_v2 }
  0x51   :  { %336 = vmatpush1.bf16.msk.msra.mxu1 %vm315_vm4, %v314_v53 }
  0x53   :  { %316 = vmatpush1.bf16.msk.msra.mxu0 %vm315_vm4, %v314_v53 }
  0xac   :  { %v61_v55 = vpop.permute.xlu1 %60  ;;  %v64_v56 = vpop.permute.xlu0 %63 }
  0xad   :  { %vm69_vm5 = vcmp.eq.s32.totalorder %v55_v57, %v64_v56  ;;  %vm68_vm15 = vcmp.eq.s32.totalorder %v55_v57, %v61_v55 }
  0xb1   :  { %v79_v58 = vpop.permute.xlu0 %78  ;;  %v97_v59 = vpop.permute.xlu1 %96 }
  0xb2   :  { %vm84_vm6 = vcmp.eq.s32.totalorder %v55_v57, %v79_v58  ;;  %vm102_vm8 = vcmp.eq.s32.totalorder %v55_v57, %v97_v59 }
  0xb3   :  { %vm87_vm7 = vmor %vm69_vm5, %vm84_vm6 }
  0xb4   :  { %vm105_vm9 = vmor %vm87_vm7, %vm102_vm8 }
  0xb6   :  { %v115_v60 = vpop.permute.xlu1 %114  ;;  %v67_v61 = vpop.permute.xlu0 %66 }
  0xb7   :  { %vm120_vm10 = vcmp.eq.s32.totalorder %v55_v57, %v115_v60  ;;  %vm70_vm13 = vcmp.eq.s32.totalorder %v55_v57, %v67_v61 }
  0xb8   :  { %vm123_vm11 = vmor %vm105_vm9, %vm120_vm10 }
  0xb9   :  { %v280_v62 = vsel %vm123_vm11, 1.0, %v443_v1 }
  0xba   :  { %137 = vst.msk [vmem:[#allocation2 + $0x18] sm:$0xff] %vm45_vm1, %v280_v62 }
  0xbb   :  { %v76_v63 = vpop.permute.xlu1 %75  ;;  %v94_v0 = vpop.permute.xlu0 %93 }
  0xbc   :  { %vm83_vm12 = vcmp.eq.s32.totalorder %v55_v57, %v76_v63  ;;  %vm101_vm6 = vcmp.eq.s32.totalorder %v55_v57, %v94_v0 }
  0xbd   :  { %vm86_vm0 = vmor %vm68_vm15, %vm83_vm12 }
  0xbe   :  { %vm104_vm8 = vmor %vm86_vm0, %vm101_vm6 }
  0xbf   :  { %v82_v2 = vpop.permute.xlu1 %81 }
  0xc0   :  { %v118_v5 = vpop.permute.xlu0 %117  ;;  %vm85_vm14 = vcmp.eq.s32.totalorder %v55_v57, %v82_v2 }
  0xc1   :  { %v142_v4 = vld [vmem:[#allocation2 + $0x18] sm:$0xff]  ;;  %vm121_vm2 = vcmp.eq.s32.totalorder %v55_v57, %v118_v5  ;;  %vm88_vm3 = vmor %vm70_vm13, %vm85_vm14 }
  0xc2   :  { %284 = vmatprep.mubr.msk.f32.mxu1 %vm45_vm1, %v142_v4 }
  0xc3   :  { %248 = vmatmul.mubr.f32.vlgmr.msra.gmra.mrb[0].mxu1 %v141_v3 }
  0xc4   :  { %v100_v6 = vpop.permute.xlu1 %99 }
  0xc5   :  { %vm103_vm4 = vcmp.eq.s32.totalorder %v55_v57, %v100_v6 }
  0xc6   :  { %vm106_vm5 = vmor %vm88_vm3, %vm103_vm4 }
  0xc7   :  { %vm124_vm7 = vmor %vm106_vm5, %vm121_vm2 }
  0xc8   :  { %v281_v7 = vsel %vm124_vm7, 1.0, %v443_v1 }
  0xc9   :  { %138 = vst.msk [vmem:[#allocation2 + $0x28] sm:$0xff] %vm45_vm1, %v281_v7  ;;  %v112_v8 = vpop.permute.xlu1 %111 }
  0xca   :  { %vm119_vm9 = vcmp.eq.s32.totalorder %v55_v57, %v112_v8 }
  0xcb   :  { %vm122_vm10 = vmor %vm104_vm8, %vm119_vm9 }
  0xcc   :  { %v279_v9 = vsel %vm122_vm10, 1.0, %v443_v1 }
  0xcd   :  { %136 = vst.msk [vmem:[#allocation2 + $0x8] sm:$0xff] %vm45_vm1, %v279_v9 }
  0xd0   :  { %v144_v11 = vld [vmem:[#allocation2 + $0x28] sm:$0xff] }
  0xd1   :  { %285 = vmatprep.mubr.msk.f32.mxu1 %vm45_vm1, %v144_v11 }
  0xd2   :  { %253 = vmatmul.mubr.f32.gmra.mrb[2].mxu1 %v143_v10 }
  0xd4   :  { %v140_v13 = vld [vmem:[#allocation2 + $0x8] sm:$0xff] }
  0xd5   :  { %283 = vmatprep.mubr.msk.f32.mxu0 %vm45_vm1, %v140_v13 }
  0xd6   :  { %243 = vmatmul.mubr.f32.vlgmr.msra.gmra.mrb[0].mxu0 %v139_v12 }
 0x196   :  { %v249_v14 = vpop.f32.mrb[0].mxu1 }
 0x197   :  { %259 = vst [vmem:[#allocation8 + $0x8] sm:$0xff] %v249_v14  ;;  %v251_v15 = vpop.f32.mrb[1].mxu1 }
 0x1a5   :  { %v254_v16 = vpop.f32.mrb[2].mxu1 }
 0x1a6   :  { %260 = vst [vmem:[#allocation8 + $0x10] sm:$0xff] %v254_v16  ;;  %v256_v1 = vpop.f32.mrb[3].mxu1 }
 0x1a9   :  { %v244_v17 = vpop.f32.mrb[0].mxu0 }
 0x1aa   :  { %258 = vst [vmem:[#allocation8] sm:$0xff] %v244_v17  ;;  %v246_v18 = vpop.f32.mrb[1].mxu0 }
 0x1ab   :  { %421 = shalt.err (!%p418_p6)
}
 0x1ac   :  { %s422_s10 = scalar_lea.hbm %s559_s2, 384 }
 0x1ad   :  { %p423_p7 = scmp.ne.s32.totalorder %s559_s2, %s422_s10  ;;  %p426_p8 = scmp.lt.u32.totalorder %s422_s10, %s559_s2 }
 0x1af   :  { %p428_p9 = pnand %p426_p8, %p423_p7 }
 0x1b1   :  { %431 = shalt.err (!%p428_p9)
}
 0x1b2   :  { %272 = dma.vmem_to_hbm [thread:$0]  %s267_s6, 384, %s559_s2, [#allocation5], %s439_s19, %s439_s19, %s440_s20  }
 0x1b3   :  { %436 = dma.done.wait [#allocation5], 384  }
 0x1b4   :  { %437 = vsyncadd [#allocation5], 4294966912 }
 0x1b5   :  { %276 = vsyncpa [#allocation4], 1 }
 0x1b6   :  { %277 = vsyncpa [#allocation7], 1 }
 0x1b7   :  { %278 = vsyncpa [#allocation5], 1 }

</bundles_post_ra>
